<compile_context>
chip_gen: v5e
topology: v5e:2x2
jax: 0.10.0
libtpu: 0.0.40
codegen_flags: <defaults>
</compile_context>

<pallas_src>
import jax
import jax.numpy as jnp
from jax.experimental import pallas as pl
from jax.experimental.pallas import tpu as pltpu


FOLD = 4  # 4 rows x 32 features = 128 lanes -> lane-dense input tiles


def _fused_affine_kernel(x_ref, w_ref, b_ref, o_ref):
    # One MXU matmul per tile; the (128, 20) block-diag weight and (1, 20)
    # bias stay VMEM-resident across grid steps.
    o_ref[...] = (
        jnp.dot(
            x_ref[...],
            w_ref[...],
            preferred_element_type=jnp.float32,
            precision=jax.lax.Precision.HIGHEST,
        )
        + b_ref[...]
    ).astype(o_ref.dtype)


def _pick_folded_tile(mf, target=8192):
    """Tile size in *folded* rows (1 folded row = FOLD original rows).

    target=8192 folded rows (= 32768 original rows) moves ~4.7 MiB of HBM
    traffic per step (multi-us of DMA vs ~0.35 us fixed overhead -> >90% of
    the HBM roofline) while the double-buffered VMEM footprint stays ~17 MiB,
    inside a 32 MiB scoped limit on every generation (v7x: 64 MiB physical).
    """
    if mf <= 16:
        return mf  # tiny problem: single full-extent block (exempt from 8-mult rule)
    # Keep at least 2 grid steps so v7x's second TensorCore gets work; the
    # tile must be a multiple of 8 (sublane) when it is not the full extent.
    t = min(target, pl.cdiv(mf, 2))
    t = max(8, (t // 8) * 8)
    return t


def model_conv1d_forward(x, params):
    """x: [B, S, 32] float32 -> [B, S, 5] float32."""
    w1, b1, w2t, b2, w3t, b3 = params
    B, S, nx = x.shape
    n_out = w3t.shape[1]
    M = B * S
    x2d = x.reshape(M, nx)

    # Collapse the activation-free 3-layer chain (tiny matmuls, HIGHEST
    # precision so the collapse adds no drift vs the un-collapsed reference).
    hp = jax.lax.Precision.HIGHEST
    wc = jnp.dot(jnp.dot(w1, w2t, precision=hp), w3t, precision=hp)        # [32, 5]
    bc = (
        jnp.dot(jnp.dot(b1, w2t, precision=hp), w3t, precision=hp)
        + jnp.dot(b2, w3t, precision=hp)
        + b3
    )                                                                       # [5]

    # Row-fold: pack FOLD rows into one 128-lane row; block-diag weight.
    M_pad = pl.cdiv(M, FOLD) * FOLD
    if M_pad != M:
        x2d = jnp.pad(x2d, ((0, M_pad - M), (0, 0)))
    Mf = M_pad // FOLD
    xf = x2d.reshape(Mf, FOLD * nx)                                  # (Mf, 128) lane-dense
    wblk = jnp.kron(jnp.eye(FOLD, dtype=wc.dtype), wc)               # (128, 20) block-diag
    bblk = jnp.tile(bc, (FOLD,)).reshape(1, FOLD * n_out)            # (1, 20)
    kf, nf = wblk.shape

    tmf = _pick_folded_tile(Mf)
    grid = (pl.cdiv(Mf, tmf),)

    cost = pl.CostEstimate(
        flops=2 * Mf * kf * nf,
        transcendentals=0,
        bytes_accessed=(Mf * kf + Mf * nf + kf * nf) * 4,
    )

    outf = pl.pallas_call(
        _fused_affine_kernel,
        out_shape=jax.ShapeDtypeStruct((Mf, nf), jnp.float32),
        grid=grid,
        in_specs=[
            pl.BlockSpec((tmf, kf), lambda i: (i, 0)),   # streamed lane-dense x tiles
            pl.BlockSpec((kf, nf), lambda i: (0, 0)),    # resident block-diag weight
            pl.BlockSpec((1, nf), lambda i: (0, 0)),     # resident bias
        ],
        out_specs=pl.BlockSpec((tmf, nf), lambda i: (i, 0)),
        compiler_params=pltpu.CompilerParams(
            dimension_semantics=("parallel",),           # megacore sharding on v7x
            vmem_limit_bytes=32 * 1024 * 1024,           # fits v5e/v6e/v7x scoped budgets
        ),
        cost_estimate=cost,
    )(xf, wblk, bblk)

    # (Mf, FOLD*n_out) flattens row-major to (M_pad, n_out) exactly.
    out = outf.reshape(M_pad, n_out)[:M]
    return out.reshape(B, S, n_out)


def init_params(key):
    k1, k2, k3, k4, k5, k6 = jax.random.split(key, 6)
    # transformers.Conv1D(nf=50, nx=32): weight [32, 50], bias [50]
    w1 = jax.random.normal(k1, (32, 50), jnp.float32) * 0.02
    b1 = jax.random.normal(k2, (50,), jnp.float32) * 0.02
    # nn.Linear(50, 32): torch weight [32, 50]; stored transposed as [50, 32]
    w2t = jax.random.normal(k3, (50, 32), jnp.float32) * 0.02
    b2 = jax.random.normal(k4, (32,), jnp.float32) * 0.02
    # nn.Linear(32, 5): torch weight [5, 32]; stored transposed as [32, 5]
    w3t = jax.random.normal(k5, (32, 5), jnp.float32) * 0.02
    b3 = jax.random.normal(k6, (5,), jnp.float32) * 0.02
    return (w1, b1, w2t, b2, w3t, b3)


def reference_forward(x, params):
    # Un-collapsed 3-matmul chain, mirrors the PyTorch module (fp32) exactly.
    hp = jax.lax.Precision.HIGHEST
    w1, b1, w2t, b2, w3t, b3 = params
    h1 = jnp.dot(x, w1, precision=hp) + b1
    h2 = jnp.dot(h1, w2t, precision=hp) + b2
    return jnp.dot(h2, w3t, precision=hp) + b3


if __name__ == "__main__":
    key = jax.random.PRNGKey(0)
    kx, kp = jax.random.split(key)
    # batch=2, seq=8, hidden=32 (Conv1D input feature dim)
    x = jax.random.normal(kx, (2, 8, 32), jnp.float32)
    params = init_params(kp)

    out = jax.jit(model_conv1d_forward)(x, params)
    out = jax.block_until_ready(out)

    ref = reference_forward(x, params)
    assert out.shape == (2, 8, 5), out.shape
    assert jnp.allclose(out, ref, atol=1e-5, rtol=1e-5), "mismatch vs reference"
    print("KERNEL_OK")
</pallas_src>

<mosaic_0001>
module attributes {stable_mosaic.version = 11 : i64} {
  func.func @_fused_affine_kernel(%arg0: i32, %arg1: memref<4x128xf32, #tpu.memory_space<vmem>>, %arg2: memref<128x20xf32, #tpu.memory_space<vmem>>, %arg3: memref<1x20xf32, #tpu.memory_space<vmem>>, %arg4: memref<4x20xf32, #tpu.memory_space<vmem>>) attributes {dimension_semantics = [#tpu.dimension_semantics<parallel>], iteration_bounds = array<i64: 1>, scalar_prefetch = 0 : i64, scratch_operands = 0 : i64, tpu.core_type = #tpu.core_type<tc>, window_params = [{transform_indices = @transform_0, window_bounds = array<i64: 4, 128>}, {pipeline_mode = #tpu.pipeline_mode<synchronous>, transform_indices = @transform_1, window_bounds = array<i64: 128, 20>}, {pipeline_mode = #tpu.pipeline_mode<synchronous>, transform_indices = @transform_2, window_bounds = array<i64: 1, 20>}, {transform_indices = @transform_3, window_bounds = array<i64: 4, 20>}]} {
    %c0 = arith.constant 0 : index
    %c0_0 = arith.constant 0 : index
    %0 = vector.load %arg1[%c0, %c0_0] : memref<4x128xf32, #tpu.memory_space<vmem>>, vector<4x128xf32>
    %c0_1 = arith.constant 0 : index
    %c0_2 = arith.constant 0 : index
    %1 = vector.load %arg2[%c0_1, %c0_2] : memref<128x20xf32, #tpu.memory_space<vmem>>, vector<128x20xf32>
    %cst = arith.constant dense<0.000000e+00> : vector<4x20xf32>
    %2 = tpu.matmul %0, %1, %cst {dimension_numbers = #tpu.dot_dimension_numbers<[1], [0], [0], [1], [0, 0, 1, 1], [], []>, precision = #tpu.contract_precision<fp32>} : vector<4x128xf32>, vector<128x20xf32>, vector<4x20xf32> -> vector<4x20xf32>
    %c0_3 = arith.constant 0 : index
    %c0_4 = arith.constant 0 : index
    %3 = vector.load %arg3[%c0_3, %c0_4] : memref<1x20xf32, #tpu.memory_space<vmem>>, vector<1x20xf32>
    %4 = vector.broadcast %3 : vector<1x20xf32> to vector<4x20xf32>
    %5 = arith.addf %2, %4 : vector<4x20xf32>
    %c0_5 = arith.constant 0 : index
    %c0_6 = arith.constant 0 : index
    %6 = vector.load %arg4[%c0_5, %c0_6] : memref<4x20xf32, #tpu.memory_space<vmem>>, vector<4x20xf32>
    tpu.vector_store %arg4[%c0_5, %c0_6], %5 {strides = array<i32>} : memref<4x20xf32, #tpu.memory_space<vmem>>, vector<4x20xf32>,
    return
  }
  func.func @transform_0(%arg0: i32) -> (i32, i32) {
    %c0_i32 = arith.constant 0 : i32
    %c0_i32_0 = arith.constant 0 : i32
    return %arg0, %c0_i32 : i32, i32
  }
  func.func @transform_1(%arg0: i32) -> (i32, i32) {
    %c0_i32 = arith.constant 0 : i32
    %c0_i32_0 = arith.constant 0 : i32
    %c0_i32_1 = arith.constant 0 : i32
    return %c0_i32, %c0_i32_0 : i32, i32
  }
  func.func @transform_2(%arg0: i32) -> (i32, i32) {
    %c0_i32 = arith.constant 0 : i32
    %c0_i32_0 = arith.constant 0 : i32
    %c0_i32_1 = arith.constant 0 : i32
    return %c0_i32, %c0_i32_0 : i32, i32
  }
  func.func @transform_3(%arg0: i32) -> (i32, i32) {
    %c0_i32 = arith.constant 0 : i32
    %c0_i32_0 = arith.constant 0 : i32
    return %arg0, %c0_i32 : i32, i32
  }
}

</mosaic_0001>

<bundles_post_ra>
// kernel: tile.8
= control target key start
LH: loop header
LB: loop body
LE: loop exit
PB: predicated region body
PF: predicated region fallthrough
CT: control target
= control target key end

     0   :  { %s22_s0 = inlined_call_operand.vmem [shape: f32[5], index: 0, kind: input, shape index: {}]   ;;  %s23_s1 = inlined_call_operand.vmem [shape: f32[4,5], index: 1, kind: output, shape index: {}]  }
   0x1   :  { %v4_v0 = vld [vmem:[%s22_s0] ss:$0 sm:$0xff] }
   0x2   :  { %5 = vst [vmem:[%s23_s1] sm:$0xf] %v4_v0 }

// kernel: tile.9
= control target key start
LH: loop header
LB: loop body
LE: loop exit
PB: predicated region body
PF: predicated region fallthrough
CT: control target
= control target key end

     0   :  { %s37_s8 = smov 5   ;;  %s38_s9 = smov 10   ;;  %vm7_vm0 = vcmask 39936   ;;  %vm13_vm1 = vcmask 162936   ;;  %vm19_vm2 = vcmask 121936   ;;  %vm25_vm3 = vcmask 80936   ;;  %s55_s0 = inlined_call_operand.vmem [shape: f32[4,5], index: 0, kind: input, shape index: {}]   ;;  %s56_s1 = inlined_call_operand.vmem [shape: f32[1,20], index: 1, kind: output, shape index: {}]  }
   0x1   :  { %v4_v0 = vld [vmem:[%s55_s0] sm:$0xf]  ;;  %s36_s0 = smov 15  }
   0x2   :  { %5 = vst [vmem:[#allocation1] sm:$0xf] %v4_v0 }
   0x9   :  { %v10_v1 = vld [vmem:[#allocation1 + $0x3] sm:$0x1]   ;;  %v22_v2 = vld [vmem:[#allocation1 + $0x1] sm:$0x1]   ;;  %v16_v3 = vld [vmem:[#allocation1 + $0x2] sm:$0x1]  }
   0xa   :  { %11 = vrot.lane.b32.xlu0 %v10_v1, %s36_s0  ;;  %23 = vrot.lane.b32.xlu1 %v22_v2, %s37_s8  ;;  %v6_v4 = vld [vmem:[#allocation1] sm:$0x1]  }
   0xb   :  { %8 = vst.msk [vmem:[#allocation0] sm:$0x1] %vm7_vm0, %v6_v4  }
  0x12   :  { %17 = vrot.lane.b32.xlu0 %v16_v3, %s38_s9 }
  0x7c   :  { %v12_v5 = vpop.permute.xlu0 %11   ;;  %v24_v6 = vpop.permute.xlu1 %23  }
  0x7d   :  { %14 = vst.msk [vmem:[#allocation0] sm:$0x1] %vm13_vm1, %v12_v5  }
  0x84   :  { %v18_v7 = vpop.permute.xlu0 %17  }
  0x85   :  { %20 = vst.msk [vmem:[#allocation0] sm:$0x1] %vm19_vm2, %v18_v7  }
  0x86   :  { %26 = vst.msk [vmem:[#allocation0] sm:$0x1] %vm25_vm3, %v24_v6  }
  0x8d   :  { %v29_v8 = vld [vmem:[#allocation0] sm:$0x1] }
  0x8e   :  { %32 = vst [vmem:[%s56_s1] sm:$0x1] %v29_v8 }

// kernel: model_conv1d_forward.1
= control target key start
LH: loop header
LB: loop body
LE: loop exit
PB: predicated region body
PF: predicated region fallthrough
CT: control target
= control target key end

     0   :  { %vm376_vm0 = vcmask 158720   ;;  %s698_s1 = inlined_call_operand.vmem [shape: f32[128,20], index: 1, kind: input, shape index: {}]   ;;  %s699_s2 = inlined_call_operand.vmem [shape: f32[1,20], index: 2, kind: input, shape index: {}]   ;;  %s700_s0 = inlined_call_operand.vmem [shape: f32[4,128], index: 0, kind: input, shape index: {}]   ;;  %s701_s3 = inlined_call_operand.vmem [shape: f32[4,20], index: 3, kind: output, shape index: {}]  }
   0x1   :  { %v30_v0 = vld [vmem:[%s698_s1 + $0x78] sm:$0xff]  ;;  %v29_v1 = vld [vmem:[%s698_s1 + $0x70] sm:$0xff]  ;;  %v28_v2 = vld [vmem:[%s698_s1 + $0x68] sm:$0xff] }
   0x2   :  { %v412_v3 = vand.u32 4294901760, %v30_v0  ;;  %v414_v4 = vand.u32 4294901760, %v29_v1  ;;  %v416_v5 = vand.u32 4294901760, %v28_v2  ;;  %v27_v6 = vld [vmem:[%s698_s1 + $0x60] sm:$0xff]  ;;  %v26_v7 = vld [vmem:[%s698_s1 + $0x58] sm:$0xff]  ;;  %v25_v8 = vld [vmem:[%s698_s1 + $0x50] sm:$0xff] }
   0x3   :  { %v427_v9 = vand.u32 4294901760, %v27_v6  ;;  %v429_v10 = vand.u32 4294901760, %v26_v7  ;;  %v431_v11 = vand.u32 4294901760, %v25_v8  ;;  %v24_v12 = vld [vmem:[%s698_s1 + $0x48] sm:$0xff]  ;;  %v23_v13 = vld [vmem:[%s698_s1 + $0x40] sm:$0xff]  ;;  %v22_v21 = vld [vmem:[%s698_s1 + $0x38] sm:$0xff] }
   0x4   :  { %36 = vmatpush.msra.mxu0 %v412_v3  ;;  %v441_v14 = vsub.f32 %v30_v0, %v412_v3  ;;  %v444_v15 = vsub.f32 %v29_v1, %v414_v4  ;;  %v447_v16 = vsub.f32 %v28_v2, %v416_v5  ;;  %v449_v17 = vand.u32 4294901760, %v24_v12  ;;  %232 = vmatpush.msra.mxu3 %v412_v3  ;;  %v21_v34 = vld [vmem:[%s698_s1 + $0x30] sm:$0xff]  ;;  %v20_v35 = vld [vmem:[%s698_s1 + $0x28] sm:$0xff]  ;;  %v19_v42 = vld [vmem:[%s698_s1 + $0x20] sm:$0xff] }
   0x5   :  { %v453_v18 = vsub.f32 %v27_v6, %v427_v9  ;;  %v456_v19 = vsub.f32 %v26_v7, %v429_v10  ;;  %v458_v20 = vand.u32 4294901760, %v23_v13  ;;  %v468_v25 = vsub.f32 %v25_v8, %v431_v11  ;;  %v18_v47 = vld [vmem:[%s698_s1 + $0x18] sm:$0xff]  ;;  %v17_v53 = vld [vmem:[%s698_s1 + $0x10] sm:$0xff]  ;;  %v16_v61 = vld [vmem:[%s698_s1 + $0x8] sm:$0xff] }
   0x6   :  { %38 = vmatpush.msra.mxu0 %v414_v4  ;;  %v78_v22 = vand.u32 4294901760, %v441_v14  ;;  %v84_v23 = vand.u32 4294901760, %v444_v15  ;;  %v90_v24 = vand.u32 4294901760, %v447_v16  ;;  %179 = vmatpush.msra.mxu2 %v441_v14  ;;  %v474_v28 = vsub.f32 %v24_v12, %v449_v17  ;;  %v15_v2 = vld [vmem:[%s698_s1] sm:$0xff] }
   0x7   :  { %v96_v26 = vand.u32 4294901760, %v453_v18  ;;  %v102_v27 = vand.u32 4294901760, %v456_v19  ;;  %234 = vmatpush.msra.mxu3 %v414_v4  ;;  %v487_v32 = vand.u32 4294901760, %v22_v21  ;;  %v491_v33 = vsub.f32 %v23_v13, %v458_v20 }
   0x8   :  { %v79_v29 = vsub.f32 %v441_v14, %v78_v22  ;;  %40 = vmatpush.msra.mxu0 %v416_v5  ;;  %v85_v30 = vsub.f32 %v444_v15, %v84_v23  ;;  %v91_v31 = vsub.f32 %v447_v16, %v90_v24  ;;  %182 = vmatpush.msra.mxu2 %v444_v15  ;;  %v108_v39 = vand.u32 4294901760, %v468_v25 }
   0x9   :  { %236 = vmatpush.msra.mxu3 %v416_v5  ;;  %v97_v38 = vsub.f32 %v453_v18, %v96_v26  ;;  %v103_v40 = vsub.f32 %v456_v19, %v102_v27  ;;  %v114_v41 = vand.u32 4294901760, %v474_v28  ;;  %v515_v44 = vand.u32 4294901760, %v21_v34 }
   0xa   :  { %v80_v36 = vand.u32 4294901760, %v79_v29  ;;  %v86_v37 = vand.u32 4294901760, %v85_v30  ;;  %42 = vmatpush.msra.mxu0 %v427_v9  ;;  %185 = vmatpush.msra.mxu2 %v447_v16  ;;  %v92_v43 = vand.u32 4294901760, %v91_v31  ;;  %v518_v45 = vsub.f32 %v22_v21, %v487_v32  ;;  %v14_v29 = vld [vmem:[%s700_s0] sm:$0xf] }
   0xb   :  { %238 = vmatpush.msra.mxu3 %v427_v9  ;;  %v520_v46 = vand.u32 4294901760, %v20_v35  ;;  %v120_v48 = vand.u32 4294901760, %v491_v33  ;;  %v98_v49 = vand.u32 4294901760, %v97_v38  ;;  %v109_v50 = vsub.f32 %v468_v25, %v108_v39 }
   0xc   :  { %81 = vmatpush.msra.mxu1 %v80_v36  ;;  %44 = vmatpush.msra.mxu0 %v429_v10  ;;  %v533_v51 = vsub.f32 %v21_v34, %v515_v44  ;;  %v535_v52 = vand.u32 4294901760, %v19_v42  ;;  %v540_v54 = vand.u32 4294901760, %v18_v47  ;;  %v104_v55 = vand.u32 4294901760, %v103_v40 }
   0xd   :  { %188 = vmatpush.msra.mxu2 %v453_v18  ;;  %240 = vmatpush.msra.mxu3 %v429_v10  ;;  %v115_v56 = vsub.f32 %v474_v28, %v114_v41  ;;  %v126_v57 = vand.u32 4294901760, %v518_v45  ;;  %v550_v58 = vsub.f32 %v20_v35, %v520_v46  ;;  %v121_v59 = vsub.f32 %v491_v33, %v120_v48 }
   0xe   :  { %87 = vmatpush.msra.mxu1 %v86_v37  ;;  %46 = vmatpush.msra.mxu0 %v431_v11  ;;  %v555_v60 = vand.u32 4294901760, %v17_v53  ;;  %v110_v62 = vand.u32 4294901760, %v109_v50  ;;  %v132_v63 = vand.u32 4294901760, %v533_v51  ;;  %v565_v0 = vsub.f32 %v19_v42, %v535_v52 }
   0xf   :  { %191 = vmatpush.msra.mxu2 %v456_v19  ;;  %242 = vmatpush.msra.mxu3 %v431_v11  ;;  %v568_v1 = vsub.f32 %v18_v47, %v540_v54  ;;  %v116_v6 = vand.u32 4294901760, %v115_v56  ;;  %v127_v7 = vsub.f32 %v518_v45, %v126_v57  ;;  %v138_v8 = vand.u32 4294901760, %v550_v58 }
  0x10   :  { %93 = vmatpush.msra.mxu1 %v92_v43  ;;  %48 = vmatpush.msra.mxu0 %v449_v17  ;;  %v580_v12 = vand.u32 4294901760, %v16_v61  ;;  %v122_v13 = vand.u32 4294901760, %v121_v59  ;;  %v583_v21 = vsub.f32 %v17_v53, %v555_v60  ;;  %v133_v30 = vsub.f32 %v533_v51, %v132_v63 }
  0x11   :  { %194 = vmatpush.msra.mxu2 %v468_v25  ;;  %244 = vmatpush.msra.mxu3 %v449_v17  ;;  %v144_v31 = vand.u32 4294901760, %v565_v0  ;;  %v595_v34 = vand.u32 4294901760, %v15_v2  ;;  %v597_v35 = vand.u32 4294901760, %v14_v29  ;;  %v150_v36 = vand.u32 4294901760, %v568_v1 }
  0x12   :  { %99 = vmatpush.msra.mxu1 %v98_v49  ;;  %50 = vmatpush.msra.mxu0 %v458_v20  ;;  %v128_v37 = vand.u32 4294901760, %v127_v7  ;;  %v139_v38 = vsub.f32 %v550_v58, %v138_v8  ;;  %v607_v40 = vsub.f32 %v16_v61, %v580_v12  ;;  %v134_v43 = vand.u32 4294901760, %v133_v30 }
  0x13   :  { %197 = vmatpush.msra.mxu2 %v474_v28  ;;  %246 = vmatpush.msra.mxu3 %v458_v20  ;;  %v68_v42 = vsub.f32 %v14_v29, %v597_v35  ;;  %v145_v47 = vsub.f32 %v565_v0, %v144_v31  ;;  %v156_v49 = vand.u32 4294901760, %v583_v21  ;;  %v618_v50 = vsub.f32 %v15_v2, %v595_v34 }
  0x14   :  { %105 = vmatpush.msra.mxu1 %v104_v55  ;;  %52 = vmatpush.msra.mxu0 %v487_v32  ;;  %v140_v53 = vand.u32 4294901760, %v139_v38  ;;  %v151_v55 = vsub.f32 %v568_v1, %v150_v36  ;;  %v162_v56 = vand.u32 4294901760, %v607_v40 }
  0x15   :  { %200 = vmatpush.msra.mxu2 %v491_v33  ;;  %248 = vmatpush.msra.mxu3 %v487_v32  ;;  %v69_v59 = vand.u32 4294901760, %v68_v42  ;;  %v146_v61 = vand.u32 4294901760, %v145_v47  ;;  %v168_v2 = vand.u32 4294901760, %v618_v50 }
  0x16   :  { %111 = vmatpush.msra.mxu1 %v110_v62  ;;  %54 = vmatpush.msra.mxu0 %v515_v44  ;;  %v157_v62 = vsub.f32 %v583_v21, %v156_v49  ;;  %v163_v7 = vsub.f32 %v607_v40, %v162_v56 }
  0x17   :  { %203 = vmatpush.msra.mxu2 %v518_v45  ;;  %250 = vmatpush.msra.mxu3 %v515_v44  ;;  %v169_v30 = vsub.f32 %v618_v50, %v168_v2 }
  0x18   :  { %117 = vmatpush.msra.mxu1 %v116_v6  ;;  %56 = vmatpush.msra.mxu0 %v520_v46  ;;  %v152_v6 = vand.u32 4294901760, %v151_v55  ;;  %v158_v29 = vand.u32 4294901760, %v157_v62 }
  0x19   :  { %206 = vmatpush.msra.mxu2 %v533_v51  ;;  %252 = vmatpush.msra.mxu3 %v520_v46 }
  0x1a   :  { %123 = vmatpush.msra.mxu1 %v122_v13  ;;  %58 = vmatpush.msra.mxu0 %v535_v52  ;;  %v70_v13 = vsub.f32 %v68_v42, %v69_v59 }
  0x1b   :  { %209 = vmatpush.msra.mxu2 %v550_v58  ;;  %254 = vmatpush.msra.mxu3 %v535_v52 }
  0x1c   :  { %129 = vmatpush.msra.mxu1 %v128_v37  ;;  %60 = vmatpush.msra.mxu0 %v540_v54  ;;  %v164_v37 = vand.u32 4294901760, %v163_v7  ;;  %v71_v38 = vand.u32 4294901760, %v70_v13 }
  0x1d   :  { %212 = vmatpush.msra.mxu2 %v565_v0  ;;  %256 = vmatpush.msra.mxu3 %v540_v54 }
  0x1e   :  { %135 = vmatpush.msra.mxu1 %v134_v43  ;;  %62 = vmatpush.msra.mxu0 %v555_v60  ;;  %v170_v43 = vand.u32 4294901760, %v169_v30 }
  0x1f   :  { %215 = vmatpush.msra.mxu2 %v568_v1  ;;  %258 = vmatpush.msra.mxu3 %v555_v60 }
  0x20   :  { %141 = vmatpush.msra.mxu1 %v140_v53  ;;  %64 = vmatpush.msra.mxu0 %v580_v12 }
  0x21   :  { %218 = vmatpush.msra.mxu2 %v583_v21  ;;  %260 = vmatpush.msra.mxu3 %v580_v12 }
  0x22   :  { %147 = vmatpush.msra.mxu1 %v146_v61  ;;  %66 = vmatpush.msra.mxu0 %v595_v34 }
  0x23   :  { %221 = vmatpush.msra.mxu2 %v607_v40  ;;  %262 = vmatpush.msra.mxu3 %v595_v34 }
  0x24   :  { %273 = vmatpush.msrb.mxu0 %v78_v22  ;;  %153 = vmatpush.msra.mxu1 %v152_v6 }
  0x25   :  { %224 = vmatpush.msra.mxu2 %v618_v50  ;;  %266 = vmatmul.f32.vlgmr.msra.gmra.mxu3 %v69_v59 }
  0x26   :  { %277 = vmatpush.msrb.mxu0 %v84_v23  ;;  %159 = vmatpush.msra.mxu1 %v158_v29 }
  0x27   :  { %227 = vmatmul.f32.vlgmr.msra.gmra.mxu2 %v68_v42  ;;  %72 = vmatmul.f32.vlgmr.msra.gmra.mxu0 %v71_v38 }
  0x28   :  { %281 = vmatpush.msrb.mxu0 %v90_v24  ;;  %165 = vmatpush.msra.mxu1 %v164_v37 }
  0x2a   :  { %285 = vmatpush.msrb.mxu0 %v96_v26  ;;  %171 = vmatpush.msra.mxu1 %v170_v43 }
  0x2b   :  { %173 = vmatmul.f32.vlgmr.msra.gmra.mxu1 %v597_v35 }
  0x2c   :  { %340 = vmatpush.msrb.mxu1 %v412_v3  ;;  %289 = vmatpush.msrb.mxu0 %v102_v27  ;;  %v382_v3 = vld [vmem:[%s699_s2] ss:$0 sm:$0xff] }
  0x2e   :  { %342 = vmatpush.msrb.mxu1 %v414_v4  ;;  %293 = vmatpush.msrb.mxu0 %v108_v39 }
  0x30   :  { %344 = vmatpush.msrb.mxu1 %v416_v5  ;;  %297 = vmatpush.msrb.mxu0 %v114_v41 }
  0x32   :  { %346 = vmatpush.msrb.mxu1 %v427_v9  ;;  %301 = vmatpush.msrb.mxu0 %v120_v48 }
  0x34   :  { %348 = vmatpush.msrb.mxu1 %v429_v10  ;;  %305 = vmatpush.msrb.mxu0 %v126_v57 }
  0x36   :  { %350 = vmatpush.msrb.mxu1 %v431_v11  ;;  %309 = vmatpush.msrb.mxu0 %v132_v63 }
  0x38   :  { %352 = vmatpush.msrb.mxu1 %v449_v17  ;;  %313 = vmatpush.msrb.mxu0 %v138_v8 }
  0x3a   :  { %354 = vmatpush.msrb.mxu1 %v458_v20  ;;  %317 = vmatpush.msrb.mxu0 %v144_v31 }
  0x3c   :  { %356 = vmatpush.msrb.mxu1 %v487_v32  ;;  %321 = vmatpush.msrb.mxu0 %v150_v36 }
  0x3e   :  { %358 = vmatpush.msrb.mxu1 %v515_v44  ;;  %325 = vmatpush.msrb.mxu0 %v156_v49 }
  0x40   :  { %360 = vmatpush.msrb.mxu1 %v520_v46  ;;  %329 = vmatpush.msrb.mxu0 %v162_v56 }
  0x42   :  { %362 = vmatpush.msrb.mxu1 %v535_v52  ;;  %333 = vmatpush.msrb.mxu0 %v168_v2 }
  0x43   :  { %335 = vmatmul.f32.vlgmr.msrb.gmra.mxu0 %v597_v35 }
  0x44   :  { %364 = vmatpush.msrb.mxu1 %v540_v54 }
  0x46   :  { %366 = vmatpush.msrb.mxu1 %v555_v60 }
  0x48   :  { %368 = vmatpush.msrb.mxu1 %v580_v12 }
  0x4a   :  { %370 = vmatpush.msrb.mxu1 %v595_v34 }
  0x4b   :  { %372 = vmatmul.f32.vlgmr.msrb.gmra.mxu1 %v597_v35 }
  0xa4   :  { %v73_v4 = vpop.f32.mrf.mxu0 }
  0xa5   :  { %v74_v5 = vadd.f32 %v382_v3, %v73_v4 }
  0xa8   :  { %v174_v9 = vpop.f32.mrf.mxu1  ;;  %v267_v15 = vpop.f32.mrf.mxu3 }
  0xa9   :  { %v175_v10 = vadd.f32 %v174_v9, %v74_v5 }
  0xaa   :  { %v228_v11 = vpop.f32.mrf.mxu2 }
  0xab   :  { %v229_v14 = vadd.f32 %v228_v11, %v175_v10 }
  0xad   :  { %v268_v16 = vadd.f32 %v267_v15, %v229_v14 }
  0xc0   :  { %v336_v17 = vpop.f32.mrf.mxu0 }
  0xc1   :  { %v337_v18 = vadd.f32 %v336_v17, %v268_v16 }
  0xc8   :  { %v373_v19 = vpop.f32.mrf.mxu1 }
  0xc9   :  { %v374_v20 = vadd.f32 %v373_v19, %v337_v18 }
  0xcb   :  { %377 = vst.msk [vmem:[%s701_s3] sm:$0xf] %vm376_vm0, %v374_v20 }

</bundles_post_ra>
